<compile_context>
chip_gen: v6e
topology: v6e:2x2x1
jax: 0.10.0
libtpu: 0.0.40
codegen_flags: <defaults>
</compile_context>

<pallas_src>
import jax
import jax.numpy as jnp
from jax import lax
from jax.experimental import pallas as pl
from jax.experimental.pallas import tpu as pltpu


def _round_up(n, m):
    return ((n + m - 1) // m) * m


def make_rnn_forward(w_ih, w_hh, b_ih, b_hh, w_fc, b_fc):
    """One-time host prep (pad / transpose / fold biases / cast to bf16) + jitted forward."""
    H, I = w_ih.shape
    O = w_fc.shape[0]

    Ip = _round_up(I, 16)     # contraction dim: bf16 sublane packing only, no 128-lane blowup
    Hp = _round_up(H, 128)    # lane-dense hidden dim
    Op = _round_up(O, 128)    # lane-dense output dim (unmasked vst)

    # Pre-transposed, zero-padded, bf16 weights; folded f32 biases.  Built once, reused per call.
    wih_t = jnp.zeros((Ip, Hp), jnp.bfloat16).at[:I, :H].set(w_ih.T.astype(jnp.bfloat16))
    whh_t = jnp.zeros((Hp, Hp), jnp.bfloat16).at[:H, :H].set(w_hh.T.astype(jnp.bfloat16))
    bias = jnp.zeros((1, Hp), jnp.float32).at[0, :H].set((b_ih + b_hh).astype(jnp.float32))
    wfc_t = jnp.zeros((Hp, Op), jnp.bfloat16).at[:H, :O].set(w_fc.T.astype(jnp.bfloat16))
    bfc = jnp.zeros((1, Op), jnp.float32).at[0, :O].set(b_fc.astype(jnp.float32))

    @jax.jit
    def forward(x):
        S, B, _ = x.shape
        Bp = _round_up(max(B, 8), 8)

        # Per-call prep: only pad x (batch -> sublane multiple) and cast to bf16.
        x_pad = jnp.zeros((S, Bp, Ip), jnp.bfloat16).at[:, :B, :I].set(x.astype(jnp.bfloat16))
        x2d = x_pad.reshape(S * Bp, Ip)

        def kernel(x_ref, wih_t_ref, whh_t_ref, bias_ref, wfc_t_ref, bfc_ref,
                   out_ref, xproj_ref):
            # 1) Input projection for ALL timesteps as one bf16 MXU matmul (f32 accumulate),
            #    with the folded RNN bias added in f32.  Stored as (S, Bp, Hp) so each step
            #    of the recurrence reads exactly one aligned (8,128)-tiled block.
            proj = jnp.dot(x_ref[...], wih_t_ref[...],
                           preferred_element_type=jnp.float32) + bias_ref[...]
            xproj_ref[...] = proj.reshape(S, Bp, Hp)

            # 2) Serial recurrence: only the W_hh term is sequentially dependent.
            #    h is carried in f32; cast to bf16 just for the MXU.
            def step(t, h):
                pre = xproj_ref[t] + jnp.dot(h.astype(jnp.bfloat16), whh_t_ref[...],
                                             preferred_element_type=jnp.float32)
                return jnp.tanh(pre)

            h = lax.fori_loop(0, S, step, jnp.zeros((Bp, Hp), jnp.float32), unroll=True)

            # 3) Fully-connected head on the final hidden state (lane-dense (Bp, Op) store).
            out_ref[...] = (jnp.dot(h.astype(jnp.bfloat16), wfc_t_ref[...],
                                    preferred_element_type=jnp.float32)
                            + bfc_ref[...]).astype(out_ref.dtype)

        vmem = pl.BlockSpec(memory_space=pltpu.MemorySpace.VMEM)
        out_pad = pl.pallas_call(
            kernel,
            out_shape=jax.ShapeDtypeStruct((Bp, Op), jnp.float32),
            in_specs=[vmem] * 6,
            out_specs=vmem,
            scratch_shapes=[pltpu.VMEM((S, Bp, Hp), jnp.float32)],  # hoisted x-projection
        )(x2d, wih_t, whh_t, bias, wfc_t, bfc)

        # forward() returns self.fc(hidden).reshape(batch_size, -1); num_layers=1 -> (B, O).
        return out_pad[:B, :O].reshape(B, -1)

    return forward


def rnn_forward_ref(x, w_ih, w_hh, b_ih, b_hh, w_fc, b_fc):
    """Pure-JAX f32 reference of the same forward pass."""
    S, B, I = x.shape
    H = w_ih.shape[0]
    h = jnp.zeros((B, H), jnp.float32)
    for t in range(S):
        h = jnp.tanh(x[t] @ w_ih.T + b_ih + h @ w_hh.T + b_hh)
    return (h @ w_fc.T + b_fc).reshape(B, -1)


if __name__ == "__main__":
    # Small shapes consistent with the module: seq=8, batch=2, input=16, hidden=32, output=10.
    S, B, I, H, O = 8, 2, 16, 32, 10

    key = jax.random.PRNGKey(0)
    kx, k1, k2, k3, k4, k5, k6 = jax.random.split(key, 7)
    scale = 1.0 / jnp.sqrt(H)  # PyTorch-style uniform(-1/sqrt(H), 1/sqrt(H))

    x = jax.random.normal(kx, (S, B, I), jnp.float32)
    w_ih = jax.random.uniform(k1, (H, I), jnp.float32, -scale, scale)
    w_hh = jax.random.uniform(k2, (H, H), jnp.float32, -scale, scale)
    b_ih = jax.random.uniform(k3, (H,), jnp.float32, -scale, scale)
    b_hh = jax.random.uniform(k4, (H,), jnp.float32, -scale, scale)
    w_fc = jax.random.uniform(k5, (O, H), jnp.float32, -scale, scale)
    b_fc = jax.random.uniform(k6, (O,), jnp.float32, -scale, scale)

    forward = make_rnn_forward(w_ih, w_hh, b_ih, b_hh, w_fc, b_fc)  # one-time weight prep
    out = jax.block_until_ready(forward(x))

    ref = rnn_forward_ref(x, w_ih, w_hh, b_ih, b_hh, w_fc, b_fc)
    assert out.shape == (B, O)
    # bf16 MXU inputs with f32 accumulation: tolerance-level agreement with the f32 reference.
    assert jnp.allclose(out, ref, atol=5e-2, rtol=5e-2), float(jnp.max(jnp.abs(out - ref)))

    print("KERNEL_OK")
</pallas_src>

<mosaic_0001>
module attributes {stable_mosaic.version = 11 : i64} {
  func.func @kernel(%arg0: memref<64x16xbf16, #tpu.memory_space<vmem>>, %arg1: memref<16x128xbf16, #tpu.memory_space<vmem>>, %arg2: memref<128x128xbf16, #tpu.memory_space<vmem>>, %arg3: memref<1x128xf32, #tpu.memory_space<vmem>>, %arg4: memref<128x128xbf16, #tpu.memory_space<vmem>>, %arg5: memref<1x128xf32, #tpu.memory_space<vmem>>, %arg6: memref<8x128xf32, #tpu.memory_space<vmem>>, %arg7: memref<8x8x128xf32, #tpu.memory_space<vmem>>) attributes {dimension_semantics = [], scalar_prefetch = 0 : i64, scratch_operands = 1 : i64, tpu.core_type = #tpu.core_type<tc>} {
    %c0 = arith.constant 0 : index
    %c0_0 = arith.constant 0 : index
    %0 = vector.load %arg0[%c0, %c0_0] : memref<64x16xbf16, #tpu.memory_space<vmem>>, vector<64x16xbf16>
    %c0_1 = arith.constant 0 : index
    %c0_2 = arith.constant 0 : index
    %1 = vector.load %arg1[%c0_1, %c0_2] : memref<16x128xbf16, #tpu.memory_space<vmem>>, vector<16x128xbf16>
    %cst = arith.constant dense<0.000000e+00> : vector<64x128xf32>
    %2 = tpu.matmul %0, %1, %cst {dimension_numbers = #tpu.dot_dimension_numbers<[1], [0], [0], [1], [0, 0, 1, 1], [], []>} : vector<64x16xbf16>, vector<16x128xbf16>, vector<64x128xf32> -> vector<64x128xf32>
    %c0_3 = arith.constant 0 : index
    %c0_4 = arith.constant 0 : index
    %3 = vector.load %arg3[%c0_3, %c0_4] : memref<1x128xf32, #tpu.memory_space<vmem>>, vector<1x128xf32>
    %4 = vector.broadcast %3 : vector<1x128xf32> to vector<64x128xf32>
    %5 = arith.addf %2, %4 : vector<64x128xf32>
    %6 = vector.shape_cast %5 : vector<64x128xf32> to vector<8x8x128xf32>
    %c0_5 = arith.constant 0 : index
    %c0_6 = arith.constant 0 : index
    %c0_7 = arith.constant 0 : index
    %7 = vector.load %arg7[%c0_5, %c0_6, %c0_7] : memref<8x8x128xf32, #tpu.memory_space<vmem>>, vector<8x8x128xf32>
    tpu.vector_store %arg7[%c0_5, %c0_6, %c0_7], %6 {strides = array<i32>} : memref<8x8x128xf32, #tpu.memory_space<vmem>>, vector<8x8x128xf32>,
    %cst_8 = arith.constant 0.000000e+00 : f32
    %8 = vector.broadcast %cst_8 : f32 to vector<8x128xf32>
    %c0_i32 = arith.constant 0 : i32
    %9 = arith.index_cast %c0_i32 : i32 to index
    %c0_9 = arith.constant 0 : index
    %c0_10 = arith.constant 0 : index
    %10 = vector.load %arg7[%9, %c0_9, %c0_10] : memref<8x8x128xf32, #tpu.memory_space<vmem>>, vector<1x8x128xf32>
    %11 = vector.shape_cast %10 : vector<1x8x128xf32> to vector<8x128xf32>
    %12 = arith.truncf %8 : vector<8x128xf32> to vector<8x128xbf16>
    %c0_11 = arith.constant 0 : index
    %c0_12 = arith.constant 0 : index
    %13 = vector.load %arg2[%c0_11, %c0_12] : memref<128x128xbf16, #tpu.memory_space<vmem>>, vector<128x128xbf16>
    %cst_13 = arith.constant dense<0.000000e+00> : vector<8x128xf32>
    %14 = tpu.matmul %12, %13, %cst_13 {dimension_numbers = #tpu.dot_dimension_numbers<[1], [0], [0], [1], [0, 0, 1, 1], [], []>} : vector<8x128xbf16>, vector<128x128xbf16>, vector<8x128xf32> -> vector<8x128xf32>
    %15 = arith.addf %11, %14 : vector<8x128xf32>
    %16 = math.tanh %15 : vector<8x128xf32>
    %c1_i32 = arith.constant 1 : i32
    %17 = arith.index_cast %c1_i32 : i32 to index
    %c0_14 = arith.constant 0 : index
    %c0_15 = arith.constant 0 : index
    %18 = vector.load %arg7[%17, %c0_14, %c0_15] : memref<8x8x128xf32, #tpu.memory_space<vmem>>, vector<1x8x128xf32>
    %19 = vector.shape_cast %18 : vector<1x8x128xf32> to vector<8x128xf32>
    %20 = arith.truncf %16 : vector<8x128xf32> to vector<8x128xbf16>
    %c0_16 = arith.constant 0 : index
    %c0_17 = arith.constant 0 : index
    %21 = vector.load %arg2[%c0_16, %c0_17] : memref<128x128xbf16, #tpu.memory_space<vmem>>, vector<128x128xbf16>
    %cst_18 = arith.constant dense<0.000000e+00> : vector<8x128xf32>
    %22 = tpu.matmul %20, %21, %cst_18 {dimension_numbers = #tpu.dot_dimension_numbers<[1], [0], [0], [1], [0, 0, 1, 1], [], []>} : vector<8x128xbf16>, vector<128x128xbf16>, vector<8x128xf32> -> vector<8x128xf32>
    %23 = arith.addf %19, %22 : vector<8x128xf32>
    %24 = math.tanh %23 : vector<8x128xf32>
    %c2_i32 = arith.constant 2 : i32
    %25 = arith.index_cast %c2_i32 : i32 to index
    %c0_19 = arith.constant 0 : index
    %c0_20 = arith.constant 0 : index
    %26 = vector.load %arg7[%25, %c0_19, %c0_20] : memref<8x8x128xf32, #tpu.memory_space<vmem>>, vector<1x8x128xf32>
    %27 = vector.shape_cast %26 : vector<1x8x128xf32> to vector<8x128xf32>
    %28 = arith.truncf %24 : vector<8x128xf32> to vector<8x128xbf16>
    %c0_21 = arith.constant 0 : index
    %c0_22 = arith.constant 0 : index
    %29 = vector.load %arg2[%c0_21, %c0_22] : memref<128x128xbf16, #tpu.memory_space<vmem>>, vector<128x128xbf16>
    %cst_23 = arith.constant dense<0.000000e+00> : vector<8x128xf32>
    %30 = tpu.matmul %28, %29, %cst_23 {dimension_numbers = #tpu.dot_dimension_numbers<[1], [0], [0], [1], [0, 0, 1, 1], [], []>} : vector<8x128xbf16>, vector<128x128xbf16>, vector<8x128xf32> -> vector<8x128xf32>
    %31 = arith.addf %27, %30 : vector<8x128xf32>
    %32 = math.tanh %31 : vector<8x128xf32>
    %c3_i32 = arith.constant 3 : i32
    %33 = arith.index_cast %c3_i32 : i32 to index
    %c0_24 = arith.constant 0 : index
    %c0_25 = arith.constant 0 : index
    %34 = vector.load %arg7[%33, %c0_24, %c0_25] : memref<8x8x128xf32, #tpu.memory_space<vmem>>, vector<1x8x128xf32>
    %35 = vector.shape_cast %34 : vector<1x8x128xf32> to vector<8x128xf32>
    %36 = arith.truncf %32 : vector<8x128xf32> to vector<8x128xbf16>
    %c0_26 = arith.constant 0 : index
    %c0_27 = arith.constant 0 : index
    %37 = vector.load %arg2[%c0_26, %c0_27] : memref<128x128xbf16, #tpu.memory_space<vmem>>, vector<128x128xbf16>
    %cst_28 = arith.constant dense<0.000000e+00> : vector<8x128xf32>
    %38 = tpu.matmul %36, %37, %cst_28 {dimension_numbers = #tpu.dot_dimension_numbers<[1], [0], [0], [1], [0, 0, 1, 1], [], []>} : vector<8x128xbf16>, vector<128x128xbf16>, vector<8x128xf32> -> vector<8x128xf32>
    %39 = arith.addf %35, %38 : vector<8x128xf32>
    %40 = math.tanh %39 : vector<8x128xf32>
    %c4_i32 = arith.constant 4 : i32
    %41 = arith.index_cast %c4_i32 : i32 to index
    %c0_29 = arith.constant 0 : index
    %c0_30 = arith.constant 0 : index
    %42 = vector.load %arg7[%41, %c0_29, %c0_30] : memref<8x8x128xf32, #tpu.memory_space<vmem>>, vector<1x8x128xf32>
    %43 = vector.shape_cast %42 : vector<1x8x128xf32> to vector<8x128xf32>
    %44 = arith.truncf %40 : vector<8x128xf32> to vector<8x128xbf16>
    %c0_31 = arith.constant 0 : index
    %c0_32 = arith.constant 0 : index
    %45 = vector.load %arg2[%c0_31, %c0_32] : memref<128x128xbf16, #tpu.memory_space<vmem>>, vector<128x128xbf16>
    %cst_33 = arith.constant dense<0.000000e+00> : vector<8x128xf32>
    %46 = tpu.matmul %44, %45, %cst_33 {dimension_numbers = #tpu.dot_dimension_numbers<[1], [0], [0], [1], [0, 0, 1, 1], [], []>} : vector<8x128xbf16>, vector<128x128xbf16>, vector<8x128xf32> -> vector<8x128xf32>
    %47 = arith.addf %43, %46 : vector<8x128xf32>
    %48 = math.tanh %47 : vector<8x128xf32>
    %c5_i32 = arith.constant 5 : i32
    %49 = arith.index_cast %c5_i32 : i32 to index
    %c0_34 = arith.constant 0 : index
    %c0_35 = arith.constant 0 : index
    %50 = vector.load %arg7[%49, %c0_34, %c0_35] : memref<8x8x128xf32, #tpu.memory_space<vmem>>, vector<1x8x128xf32>
    %51 = vector.shape_cast %50 : vector<1x8x128xf32> to vector<8x128xf32>
    %52 = arith.truncf %48 : vector<8x128xf32> to vector<8x128xbf16>
    %c0_36 = arith.constant 0 : index
    %c0_37 = arith.constant 0 : index
    %53 = vector.load %arg2[%c0_36, %c0_37] : memref<128x128xbf16, #tpu.memory_space<vmem>>, vector<128x128xbf16>
    %cst_38 = arith.constant dense<0.000000e+00> : vector<8x128xf32>
    %54 = tpu.matmul %52, %53, %cst_38 {dimension_numbers = #tpu.dot_dimension_numbers<[1], [0], [0], [1], [0, 0, 1, 1], [], []>} : vector<8x128xbf16>, vector<128x128xbf16>, vector<8x128xf32> -> vector<8x128xf32>
    %55 = arith.addf %51, %54 : vector<8x128xf32>
    %56 = math.tanh %55 : vector<8x128xf32>
    %c6_i32 = arith.constant 6 : i32
    %57 = arith.index_cast %c6_i32 : i32 to index
    %c0_39 = arith.constant 0 : index
    %c0_40 = arith.constant 0 : index
    %58 = vector.load %arg7[%57, %c0_39, %c0_40] : memref<8x8x128xf32, #tpu.memory_space<vmem>>, vector<1x8x128xf32>
    %59 = vector.shape_cast %58 : vector<1x8x128xf32> to vector<8x128xf32>
    %60 = arith.truncf %56 : vector<8x128xf32> to vector<8x128xbf16>
    %c0_41 = arith.constant 0 : index
    %c0_42 = arith.constant 0 : index
    %61 = vector.load %arg2[%c0_41, %c0_42] : memref<128x128xbf16, #tpu.memory_space<vmem>>, vector<128x128xbf16>
    %cst_43 = arith.constant dense<0.000000e+00> : vector<8x128xf32>
    %62 = tpu.matmul %60, %61, %cst_43 {dimension_numbers = #tpu.dot_dimension_numbers<[1], [0], [0], [1], [0, 0, 1, 1], [], []>} : vector<8x128xbf16>, vector<128x128xbf16>, vector<8x128xf32> -> vector<8x128xf32>
    %63 = arith.addf %59, %62 : vector<8x128xf32>
    %64 = math.tanh %63 : vector<8x128xf32>
    %c7_i32 = arith.constant 7 : i32
    %65 = arith.index_cast %c7_i32 : i32 to index
    %c0_44 = arith.constant 0 : index
    %c0_45 = arith.constant 0 : index
    %66 = vector.load %arg7[%65, %c0_44, %c0_45] : memref<8x8x128xf32, #tpu.memory_space<vmem>>, vector<1x8x128xf32>
    %67 = vector.shape_cast %66 : vector<1x8x128xf32> to vector<8x128xf32>
    %68 = arith.truncf %64 : vector<8x128xf32> to vector<8x128xbf16>
    %c0_46 = arith.constant 0 : index
    %c0_47 = arith.constant 0 : index
    %69 = vector.load %arg2[%c0_46, %c0_47] : memref<128x128xbf16, #tpu.memory_space<vmem>>, vector<128x128xbf16>
    %cst_48 = arith.constant dense<0.000000e+00> : vector<8x128xf32>
    %70 = tpu.matmul %68, %69, %cst_48 {dimension_numbers = #tpu.dot_dimension_numbers<[1], [0], [0], [1], [0, 0, 1, 1], [], []>} : vector<8x128xbf16>, vector<128x128xbf16>, vector<8x128xf32> -> vector<8x128xf32>
    %71 = arith.addf %67, %70 : vector<8x128xf32>
    %72 = math.tanh %71 : vector<8x128xf32>
    %c8_i32 = arith.constant 8 : i32
    %73 = arith.truncf %72 : vector<8x128xf32> to vector<8x128xbf16>
    %c0_49 = arith.constant 0 : index
    %c0_50 = arith.constant 0 : index
    %74 = vector.load %arg4[%c0_49, %c0_50] : memref<128x128xbf16, #tpu.memory_space<vmem>>, vector<128x128xbf16>
    %cst_51 = arith.constant dense<0.000000e+00> : vector<8x128xf32>
    %75 = tpu.matmul %73, %74, %cst_51 {dimension_numbers = #tpu.dot_dimension_numbers<[1], [0], [0], [1], [0, 0, 1, 1], [], []>} : vector<8x128xbf16>, vector<128x128xbf16>, vector<8x128xf32> -> vector<8x128xf32>
    %c0_52 = arith.constant 0 : index
    %c0_53 = arith.constant 0 : index
    %76 = vector.load %arg5[%c0_52, %c0_53] : memref<1x128xf32, #tpu.memory_space<vmem>>, vector<1x128xf32>
    %77 = vector.broadcast %76 : vector<1x128xf32> to vector<8x128xf32>
    %78 = arith.addf %75, %77 : vector<8x128xf32>
    %c0_54 = arith.constant 0 : index
    %c0_55 = arith.constant 0 : index
    %79 = vector.load %arg6[%c0_54, %c0_55] : memref<8x128xf32, #tpu.memory_space<vmem>>, vector<8x128xf32>
    tpu.vector_store %arg6[%c0_54, %c0_55], %78 {strides = array<i32>} : memref<8x128xf32, #tpu.memory_space<vmem>>, vector<8x128xf32>,
    return
  }
}

</mosaic_0001>

<bundles_post_ra>
// kernel: forward.1
= control target key start
LH: loop header
LB: loop body
LE: loop exit
PB: predicated region body
PF: predicated region fallthrough
CT: control target
= control target key end

     0   :  { %11 = vsyncpa [#allocation4], 0  ;;  %s1405_s0 = inlined_call_operand.vmem [shape: bf16[64,16], index: 0, kind: input, shape index: {}]   ;;  %s1406_s1 = inlined_call_operand.hbm [shape: bf16[16,128], index: 1, kind: input, shape index: {}]   ;;  %s1407_s2 = inlined_call_operand.hbm [shape: bf16[128,128], index: 2, kind: input, shape index: {}]   ;;  %s1408_s3 = inlined_call_operand.vmem [shape: f32[1,128], index: 3, kind: input, shape index: {}]   ;;  %s1409_s4 = inlined_call_operand.vmem [shape: bf16[128,128], index: 4, kind: input, shape index: {}]   ;;  %s1410_s5 = inlined_call_operand.vmem [shape: f32[1,128], index: 5, kind: input, shape index: {}]   ;;  %s1411_s6 = inlined_call_operand.vmem [shape: f32[8,128], index: 6, kind: output, shape index: {}]  }
   0x1   :  { %12 = vsyncpa [#allocation6], 0  ;;  %s1113_s21 = smov [#allocation3]  }
   0x2   :  { %s20_s22 = sshll.u32 %s1113_s21, 4  ;;  %s21_s22 = int_to_ptr.vmem [resolvable:$true] %s20_s22 }
   0x3   :  { %s1077_s23 = scalar_lea.vmem %s21_s22, 128  ;;  %p1082_p1 = scmp.lt.s32.totalorder %s21_s22, %s21_s22 }
   0x4   :  { %p1078_p0 = scmp.ne.s32.totalorder %s21_s22, %s1077_s23  ;;  %p1083_p2 = scmp.lt.s32.totalorder %s1077_s23, %s1077_s23 }
   0x6   :  { %p1084_p3 = por %p1083_p2, %p1082_p1 }
   0x8   :  { %p1085_p4 = pnand %p1084_p3, %p1078_p0 }
   0xa   :  { %1088 = shalt.err (!%p1085_p4)
}
   0xb   :  { %s1114_s24 = smov 64   ;;  %s1115_s25 = smov 4  }
   0xc   :  { %26 = dma.hbm_to_vmem [thread:$0]  %s1406_s1, 128, %s21_s22, [#allocation4], %s1114_s24, %s1114_s24, %s1115_s25  }
   0xd   :  { %s1116_s28 = smov [#allocation5]  }
   0xe   :  { %s32_s29 = sshll.u32 %s1116_s28, 4  ;;  %s33_s29 = int_to_ptr.vmem [resolvable:$true] %s32_s29 }
   0xf   :  { %s1097_s30 = scalar_lea.vmem %s33_s29, 1024  ;;  %p1102_p6 = scmp.lt.s32.totalorder %s33_s29, %s33_s29 }
  0x10   :  { %p1098_p5 = scmp.ne.s32.totalorder %s33_s29, %s1097_s30  ;;  %p1103_p7 = scmp.lt.s32.totalorder %s1097_s30, %s1097_s30 }
  0x12   :  { %p1104_p8 = por %p1103_p7, %p1102_p6 }
  0x14   :  { %p1105_p9 = pnand %p1104_p8, %p1098_p5 }
  0x16   :  { %1108 = shalt.err (!%p1105_p9)
}
  0x17   :  { %38 = dma.hbm_to_vmem [thread:$0]  %s1407_s2, 1024, %s33_s29, [#allocation6], %s1114_s24, %s1114_s24, %s1115_s25  }
  0x18   :  { %1109 = dma.done.wait [#allocation4], 128  }
  0x19   :  { %1110 = vsyncadd [#allocation4], 4294967168 }
  0x1a   :  { %1111 = dma.done.wait [#allocation6], 1024  }
  0x1b   :  { %1112 = vsyncadd [#allocation6], 4294966272  ;;  %v1117_v0 = vmov 0.0   ;;  %vm1118_vm0 = vmmov 0   ;;  %v1164_v1 = vld [vmem:[#allocation5 + $0x38] sm:$0xff]   ;;  %v1167_v2 = vld [vmem:[#allocation5 + $0x30] sm:$0xff]  }
  0x1c   :  { %845 = vmatprep.subr.bf16.mxu1 %v1117_v0  ;;  %861 = vmatprep.mubr.msk.bf16.mxu1 %vm1118_vm0, %v1117_v0  ;;  %v1170_v3 = vld [vmem:[#allocation5 + $0x28] sm:$0xff]   ;;  %v1037_v4 = vld [vmem:[#allocation3] sm:$0xff]   ;;  %vm95_vm1 = vcmask 130048   ;;  %v1040_v6 = vld [vmem:[%s1405_s0 + $0x8] sm:$0xff]   ;;  %v1119_v12 = vmov 0  }
  0x1d   :  { %846 = vmatpush3.bf16.msra.mxu1 %v1164_v1  ;;  %v1038_v5 = vld [vmem:[%s1405_s0] sm:$0xff]   ;;  %835 = vmatprep.subr.bf16.mxu0 %v1037_v4  ;;  %v1183_v7 = vld [vmem:[#allocation5 + $0x20] sm:$0xff]   ;;  %v1196_v9 = vld [vmem:[#allocation5 + $0x10] sm:$0xff]  }
  0x1e   :  { %847 = vmatprep.subr.bf16.mxu1 %v1117_v0  ;;  %836 = vmatpush3.bf16.msra.mxu0 %v1037_v4  ;;  %v1187_v8 = vld [vmem:[#allocation5 + $0x18] sm:$0xff]   ;;  %v1202_v10 = vld [vmem:[#allocation5 + $0x8] sm:$0xff]   ;;  %v1208_v11 = vld [vmem:[#allocation5] sm:$0xff]  }
  0x1f   :  { %837 = vmatprep.mubr.msk.bf16.mxu0 %vm95_vm1, %v1038_v5  ;;  %865 = vmatprep.subr.bf16.mxu0 %v1117_v0  ;;  %v1043_v13 = vld [vmem:[%s1405_s0 + $0x10] sm:$0xff]   ;;  %v1044_v14 = vld [vmem:[%s1405_s0 + $0x18] sm:$0xff]   ;;  %v1254_v16 = vld [vmem:[%s1408_s3] ss:$0 sm:$0xff] }
  0x21   :  { %848 = vmatpush3.bf16.msra.mxu1 %v1167_v2  ;;  %838 = vmatmul.mubr.msk.bf16.vlgmr.msra.gmra.mxu0 %vm95_vm1, %v1040_v6 }
  0x22   :  { %849 = vmatprep.subr.bf16.mxu1 %v1117_v0  ;;  %866 = vmatpush3.bf16.msra.mxu0 %v1164_v1 }
  0x23   :  { %867 = vmatprep.subr.bf16.mxu0 %v1117_v0  ;;  %841 = vmatprep.mubr.msk.bf16.mxu0 %vm95_vm1, %v1043_v13 }
  0x25   :  { %850 = vmatpush3.bf16.msra.mxu1 %v1170_v3 }
  0x26   :  { %851 = vmatprep.subr.bf16.mxu1 %v1117_v0  ;;  %868 = vmatpush3.bf16.msra.mxu0 %v1167_v2 }
  0x27   :  { %869 = vmatprep.subr.bf16.mxu0 %v1117_v0 }
  0x29   :  { %852 = vmatpush3.bf16.msra.mxu1 %v1183_v7  ;;  %842 = vmatmul.mubr.msk.bf16.gmra.mxu0 %vm95_vm1, %v1044_v14 }
  0x2a   :  { %853 = vmatprep.subr.bf16.mxu1 %v1117_v0  ;;  %870 = vmatpush3.bf16.msra.mxu0 %v1170_v3 }
  0x2b   :  { %871 = vmatprep.subr.bf16.mxu0 %v1117_v0  ;;  %881 = vmatprep.mubr.msk.bf16.mxu0 %vm1118_vm0, %v1117_v0 }
  0x2d   :  { %854 = vmatpush3.bf16.msra.mxu1 %v1187_v8 }
  0x2e   :  { %855 = vmatprep.subr.bf16.mxu1 %v1117_v0  ;;  %872 = vmatpush3.bf16.msra.mxu0 %v1183_v7 }
  0x2f   :  { %873 = vmatprep.subr.bf16.mxu0 %v1117_v0 }
  0x31   :  { %856 = vmatpush3.bf16.msra.mxu1 %v1196_v9 }
  0x32   :  { %857 = vmatprep.subr.bf16.mxu1 %v1117_v0  ;;  %874 = vmatpush3.bf16.msra.mxu0 %v1187_v8 }
  0x33   :  { %875 = vmatprep.subr.bf16.mxu0 %v1117_v0 }
  0x35   :  { %858 = vmatpush3.bf16.msra.mxu1 %v1202_v10 }
  0x36   :  { %859 = vmatprep.subr.bf16.mxu1 %v1117_v0  ;;  %876 = vmatpush3.bf16.msra.mxu0 %v1196_v9 }
  0x37   :  { %877 = vmatprep.subr.bf16.mxu0 %v1117_v0 }
  0x39   :  { %860 = vmatpush3.bf16.msra.mxu1 %v1208_v11 }
  0x3a   :  { %885 = vmatprep.subr.bf16.mxu1 %v1117_v0  ;;  %878 = vmatpush3.bf16.msra.mxu0 %v1202_v10 }
  0x3b   :  { %879 = vmatprep.subr.bf16.mxu0 %v1117_v0 }
  0x3c   :  { %862 = vmatmul.mubr.bf16.vlgmr.msra.gmra.mxu1 %v1119_v12 }
  0x3d   :  { %886 = vmatpush3.bf16.msra.mxu1 %v1164_v1  ;;  %901 = vmatprep.mubr.msk.bf16.mxu1 %vm1118_vm0, %v1117_v0 }
  0x3e   :  { %887 = vmatprep.subr.bf16.mxu1 %v1117_v0  ;;  %880 = vmatpush3.bf16.msra.mxu0 %v1208_v11 }
  0x3f   :  { %905 = vmatprep.subr.bf16.mxu0 %v1117_v0 }
  0x41   :  { %888 = vmatpush3.bf16.msra.mxu1 %v1167_v2 }
  0x42   :  { %889 = vmatprep.subr.bf16.mxu1 %v1117_v0 }
  0x45   :  { %890 = vmatpush3.bf16.msra.mxu1 %v1170_v3 }
  0x46   :  { %891 = vmatprep.subr.bf16.mxu1 %v1117_v0 }
  0x49   :  { %892 = vmatpush3.bf16.msra.mxu1 %v1183_v7 }
  0x4a   :  { %893 = vmatprep.subr.bf16.mxu1 %v1117_v0 }
  0x4d   :  { %894 = vmatpush3.bf16.msra.mxu1 %v1187_v8 }
  0x4e   :  { %895 = vmatprep.subr.bf16.mxu1 %v1117_v0 }
  0x51   :  { %896 = vmatpush3.bf16.msra.mxu1 %v1196_v9 }
  0x52   :  { %897 = vmatprep.subr.bf16.mxu1 %v1117_v0 }
  0x55   :  { %898 = vmatpush3.bf16.msra.mxu1 %v1202_v10 }
  0x56   :  { %899 = vmatprep.subr.bf16.mxu1 %v1117_v0 }
  0x59   :  { %900 = vmatpush3.bf16.msra.mxu1 %v1208_v11 }
  0x5a   :  { %925 = vmatprep.subr.bf16.mxu1 %v1117_v0 }
  0xe1   :  { %v1249_v15 = vpop.f32.mrf.mxu0 }
  0xe2   :  { %v151_v40 = vadd.f32 %v1249_v15, %v1254_v16 }
  0xe3   :  { %v142_v17 = vpop.f32.mrf.mxu0 }
  0xe4   :  { %v143_v18 = vadd.f32 %v1254_v16, %v142_v17 }
  0xe5   :  { %v840_v26 = vpop.f32.mrf.mxu0 }
  0xe6   :  { %v154_v48 = vadd.f32 %v840_v26, %v1254_v16 }
  0xe7   :  { %v145_v27 = vpop.f32.mrf.mxu0 }
  0xe8   :  { %v146_v32 = vadd.f32 %v1254_v16, %v145_v27 }
  0xe9   :  { %v1275_v28 = vpop.f32.mrf.mxu0 }
  0xea   :  { %v167_v12 = vadd.f32 %v1275_v28, %v1254_v16 }
  0xeb   :  { %v1277_v29 = vpop.f32.mrf.mxu0 }
  0xec   :  { %v159_v56 = vadd.f32 %v1254_v16, %v1277_v29 }
  0xed   :  { %v1279_v30 = vpop.f32.mrf.mxu0 }
  0xee   :  { %v170_v26 = vadd.f32 %v1279_v30, %v1254_v16 }
  0xef   :  { %v1281_v31 = vpop.f32.mrf.mxu0 }
  0xfc   :  { %v280_v19 = vpop.f32.mrf.mxu1 }
  0xfd   :  { %v286_v20 = vadd.f32 %v280_v19, %v143_v18 }
  0xfe   :  { %v863_v21 = vpop.f32.mrf.mxu1 }
  0xff   :  { %1053 = vtanh.f32 %v286_v20  ;;  %v1048_v21 = vld [vmem:[%s1409_s4 + $0x20] sm:$0xff]  }
 0x100   :  { %v283_v22 = vpop.f32.mrf.mxu1 }
 0x101   :  { %v1049_v22 = vld [vmem:[%s1409_s4 + $0x18] sm:$0xff]  }
 0x102   :  { %v864_v23 = vpop.f32.mrf.mxu1 }
 0x103   :  { %v1050_v23 = vld [vmem:[%s1409_s4 + $0x10] sm:$0xff]  }
 0x10c   :  { %v1054_v24 = vpop.eup %1053 }
 0x10d   :  { %v290_v25 = vpack.c.bf16 %v1054_v24, %v1054_v24  ;;  %v1051_v24 = vld [vmem:[%s1409_s4 + $0x8] sm:$0xff]  }
 0x10f   :  { %882 = vmatmul.mubr.bf16.vlgmr.msra.gmra.mxu0 %v290_v25  ;;  %v1052_v25 = vld [vmem:[%s1409_s4] sm:$0xff]  }
 0x110   :  { %906 = vmatpush3.bf16.msra.mxu0 %v1164_v1  ;;  %921 = vmatprep.mubr.msk.bf16.mxu0 %vm1118_vm0, %v1117_v0 }
 0x111   :  { %907 = vmatprep.subr.bf16.mxu0 %v1117_v0 }
 0x114   :  { %908 = vmatpush3.bf16.msra.mxu0 %v1167_v2 }
 0x115   :  { %909 = vmatprep.subr.bf16.mxu0 %v1117_v0 }
 0x118   :  { %910 = vmatpush3.bf16.msra.mxu0 %v1170_v3 }
 0x119   :  { %911 = vmatprep.subr.bf16.mxu0 %v1117_v0 }
 0x11c   :  { %912 = vmatpush3.bf16.msra.mxu0 %v1183_v7 }
 0x11d   :  { %913 = vmatprep.subr.bf16.mxu0 %v1117_v0 }
 0x120   :  { %914 = vmatpush3.bf16.msra.mxu0 %v1187_v8 }
 0x121   :  { %915 = vmatprep.subr.bf16.mxu0 %v1117_v0 }
 0x124   :  { %916 = vmatpush3.bf16.msra.mxu0 %v1196_v9 }
 0x125   :  { %917 = vmatprep.subr.bf16.mxu0 %v1117_v0 }
 0x128   :  { %918 = vmatpush3.bf16.msra.mxu0 %v1202_v10 }
 0x129   :  { %919 = vmatprep.subr.bf16.mxu0 %v1117_v0 }
 0x12c   :  { %920 = vmatpush3.bf16.msra.mxu0 %v1208_v11 }
 0x12d   :  { %945 = vmatprep.subr.bf16.mxu0 %v1117_v0 }
 0x1cf   :  { %v325_v33 = vpop.f32.mrf.mxu0 }
 0x1d0   :  { %v331_v34 = vadd.f32 %v325_v33, %v146_v32 }
 0x1d1   :  { %v883_v35 = vpop.f32.mrf.mxu0 }
 0x1d2   :  { %1055 = vtanh.f32 %v331_v34 }
 0x1d3   :  { %v328_v36 = vpop.f32.mrf.mxu0 }
 0x1d5   :  { %v884_v37 = vpop.f32.mrf.mxu0 }
 0x1df   :  { %v1056_v38 = vpop.eup %1055 }
 0x1e0   :  { %v335_v39 = vpack.c.bf16 %v1056_v38, %v1056_v38 }
 0x1e2   :  { %902 = vmatmul.mubr.bf16.vlgmr.msra.gmra.mxu1 %v335_v39 }
 0x1e3   :  { %926 = vmatpush3.bf16.msra.mxu1 %v1164_v1  ;;  %941 = vmatprep.mubr.msk.bf16.mxu1 %vm1118_vm0, %v1117_v0 }
 0x1e4   :  { %927 = vmatprep.subr.bf16.mxu1 %v1117_v0 }
 0x1e7   :  { %928 = vmatpush3.bf16.msra.mxu1 %v1167_v2 }
 0x1e8   :  { %929 = vmatprep.subr.bf16.mxu1 %v1117_v0 }
 0x1eb   :  { %930 = vmatpush3.bf16.msra.mxu1 %v1170_v3 }
 0x1ec   :  { %931 = vmatprep.subr.bf16.mxu1 %v1117_v0 }
 0x1ef   :  { %932 = vmatpush3.bf16.msra.mxu1 %v1183_v7 }
 0x1f0   :  { %933 = vmatprep.subr.bf16.mxu1 %v1117_v0 }
 0x1f3   :  { %934 = vmatpush3.bf16.msra.mxu1 %v1187_v8 }
 0x1f4   :  { %935 = vmatprep.subr.bf16.mxu1 %v1117_v0 }
 0x1f7   :  { %936 = vmatpush3.bf16.msra.mxu1 %v1196_v9 }
 0x1f8   :  { %937 = vmatprep.subr.bf16.mxu1 %v1117_v0 }
 0x1fb   :  { %938 = vmatpush3.bf16.msra.mxu1 %v1202_v10 }
 0x1fc   :  { %939 = vmatprep.subr.bf16.mxu1 %v1117_v0 }
 0x1ff   :  { %940 = vmatpush3.bf16.msra.mxu1 %v1208_v11 }
 0x200   :  { %965 = vmatprep.subr.bf16.mxu1 %v1117_v0 }
 0x2a2   :  { %v370_v41 = vpop.f32.mrf.mxu1 }
 0x2a3   :  { %v376_v42 = vadd.f32 %v370_v41, %v151_v40 }
 0x2a4   :  { %v903_v43 = vpop.f32.mrf.mxu1 }
 0x2a5   :  { %1057 = vtanh.f32 %v376_v42 }
 0x2a6   :  { %v373_v44 = vpop.f32.mrf.mxu1 }
 0x2a8   :  { %v904_v45 = vpop.f32.mrf.mxu1 }
 0x2b2   :  { %v1058_v46 = vpop.eup %1057 }
 0x2b3   :  { %v380_v47 = vpack.c.bf16 %v1058_v46, %v1058_v46 }
 0x2b5   :  { %922 = vmatmul.mubr.bf16.vlgmr.msra.gmra.mxu0 %v380_v47 }
 0x2b6   :  { %946 = vmatpush3.bf16.msra.mxu0 %v1164_v1  ;;  %961 = vmatprep.mubr.msk.bf16.mxu0 %vm1118_vm0, %v1117_v0 }
 0x2b7   :  { %947 = vmatprep.subr.bf16.mxu0 %v1117_v0 }
 0x2ba   :  { %948 = vmatpush3.bf16.msra.mxu0 %v1167_v2 }
 0x2bb   :  { %949 = vmatprep.subr.bf16.mxu0 %v1117_v0 }
 0x2be   :  { %950 = vmatpush3.bf16.msra.mxu0 %v1170_v3 }
 0x2bf   :  { %951 = vmatprep.subr.bf16.mxu0 %v1117_v0 }
 0x2c2   :  { %952 = vmatpush3.bf16.msra.mxu0 %v1183_v7 }
 0x2c3   :  { %953 = vmatprep.subr.bf16.mxu0 %v1117_v0 }
 0x2c6   :  { %954 = vmatpush3.bf16.msra.mxu0 %v1187_v8 }
 0x2c7   :  { %955 = vmatprep.subr.bf16.mxu0 %v1117_v0 }
 0x2ca   :  { %956 = vmatpush3.bf16.msra.mxu0 %v1196_v9 }
 0x2cb   :  { %957 = vmatprep.subr.bf16.mxu0 %v1117_v0 }
 0x2ce   :  { %958 = vmatpush3.bf16.msra.mxu0 %v1202_v10 }
 0x2cf   :  { %959 = vmatprep.subr.bf16.mxu0 %v1117_v0 }
 0x2d2   :  { %960 = vmatpush3.bf16.msra.mxu0 %v1208_v11 }
 0x2d3   :  { %985 = vmatprep.subr.bf16.mxu0 %v1117_v0 }
 0x375   :  { %v415_v49 = vpop.f32.mrf.mxu0 }
 0x376   :  { %v421_v50 = vadd.f32 %v415_v49, %v154_v48 }
 0x377   :  { %v923_v51 = vpop.f32.mrf.mxu0 }
 0x378   :  { %1059 = vtanh.f32 %v421_v50 }
 0x379   :  { %v418_v52 = vpop.f32.mrf.mxu0 }
 0x37b   :  { %v924_v53 = vpop.f32.mrf.mxu0 }
 0x385   :  { %v1060_v54 = vpop.eup %1059 }
 0x386   :  { %v425_v55 = vpack.c.bf16 %v1060_v54, %v1060_v54 }
 0x388   :  { %942 = vmatmul.mubr.bf16.vlgmr.msra.gmra.mxu1 %v425_v55 }
 0x389   :  { %966 = vmatpush3.bf16.msra.mxu1 %v1164_v1  ;;  %981 = vmatprep.mubr.msk.bf16.mxu1 %vm1118_vm0, %v1117_v0 }
 0x38a   :  { %967 = vmatprep.subr.bf16.mxu1 %v1117_v0 }
 0x38d   :  { %968 = vmatpush3.bf16.msra.mxu1 %v1167_v2 }
 0x38e   :  { %969 = vmatprep.subr.bf16.mxu1 %v1117_v0 }
 0x391   :  { %970 = vmatpush3.bf16.msra.mxu1 %v1170_v3 }
 0x392   :  { %971 = vmatprep.subr.bf16.mxu1 %v1117_v0 }
 0x395   :  { %972 = vmatpush3.bf16.msra.mxu1 %v1183_v7 }
 0x396   :  { %973 = vmatprep.subr.bf16.mxu1 %v1117_v0 }
 0x399   :  { %974 = vmatpush3.bf16.msra.mxu1 %v1187_v8 }
 0x39a   :  { %975 = vmatprep.subr.bf16.mxu1 %v1117_v0 }
 0x39d   :  { %976 = vmatpush3.bf16.msra.mxu1 %v1196_v9 }
 0x39e   :  { %977 = vmatprep.subr.bf16.mxu1 %v1117_v0 }
 0x3a1   :  { %978 = vmatpush3.bf16.msra.mxu1 %v1202_v10 }
 0x3a2   :  { %979 = vmatprep.subr.bf16.mxu1 %v1117_v0 }
 0x3a5   :  { %980 = vmatpush3.bf16.msra.mxu1 %v1208_v11 }
 0x3a6   :  { %1005 = vmatprep.subr.bf16.mxu1 %v1117_v0 }
 0x448   :  { %v460_v57 = vpop.f32.mrf.mxu1 }
 0x449   :  { %v466_v58 = vadd.f32 %v460_v57, %v159_v56 }
 0x44a   :  { %v943_v59 = vpop.f32.mrf.mxu1 }
 0x44b   :  { %1061 = vtanh.f32 %v466_v58 }
 0x44c   :  { %v463_v60 = vpop.f32.mrf.mxu1 }
 0x44e   :  { %v944_v61 = vpop.f32.mrf.mxu1 }
 0x458   :  { %v1062_v62 = vpop.eup %1061 }
 0x459   :  { %v470_v63 = vpack.c.bf16 %v1062_v62, %v1062_v62 }
 0x45b   :  { %962 = vmatmul.mubr.bf16.vlgmr.msra.gmra.mxu0 %v470_v63 }
 0x45c   :  { %986 = vmatpush3.bf16.msra.mxu0 %v1164_v1  ;;  %1001 = vmatprep.mubr.msk.bf16.mxu0 %vm1118_vm0, %v1117_v0  ;;  %v162_v1 = vadd.f32 %v1254_v16, %v1281_v31 }
 0x45d   :  { %987 = vmatprep.subr.bf16.mxu0 %v1117_v0 }
 0x460   :  { %988 = vmatpush3.bf16.msra.mxu0 %v1167_v2 }
 0x461   :  { %989 = vmatprep.subr.bf16.mxu0 %v1117_v0 }
 0x464   :  { %990 = vmatpush3.bf16.msra.mxu0 %v1170_v3 }
 0x465   :  { %991 = vmatprep.subr.bf16.mxu0 %v1117_v0 }
 0x468   :  { %992 = vmatpush3.bf16.msra.mxu0 %v1183_v7 }
 0x469   :  { %993 = vmatprep.subr.bf16.mxu0 %v1117_v0 }
 0x46c   :  { %994 = vmatpush3.bf16.msra.mxu0 %v1187_v8 }
 0x46d   :  { %995 = vmatprep.subr.bf16.mxu0 %v1117_v0 }
 0x470   :  { %996 = vmatpush3.bf16.msra.mxu0 %v1196_v9  ;;  %v1045_v9 = vld [vmem:[%s1409_s4 + $0x38] sm:$0xff]  }
 0x471   :  { %997 = vmatprep.subr.bf16.mxu0 %v1117_v0 }
 0x474   :  { %998 = vmatpush3.bf16.msra.mxu0 %v1202_v10  ;;  %v1046_v10 = vld [vmem:[%s1409_s4 + $0x30] sm:$0xff]  }
 0x475   :  { %999 = vmatprep.subr.bf16.mxu0 %v1117_v0 }
 0x478   :  { %1000 = vmatpush3.bf16.msra.mxu0 %v1208_v11  ;;  %v1047_v11 = vld [vmem:[%s1409_s4 + $0x28] sm:$0xff]  }
 0x51b   :  { %v505_v2 = vpop.f32.mrf.mxu0 }
 0x51c   :  { %v511_v3 = vadd.f32 %v505_v2, %v162_v1 }
 0x51d   :  { %v963_v4 = vpop.f32.mrf.mxu0 }
 0x51e   :  { %1063 = vtanh.f32 %v511_v3 }
 0x51f   :  { %v508_v5 = vpop.f32.mrf.mxu0 }
 0x521   :  { %v964_v6 = vpop.f32.mrf.mxu0 }
 0x52b   :  { %v1064_v7 = vpop.eup %1063 }
 0x52c   :  { %v515_v8 = vpack.c.bf16 %v1064_v7, %v1064_v7 }
 0x52e   :  { %982 = vmatmul.mubr.bf16.vlgmr.msra.gmra.mxu1 %v515_v8 }
 0x52f   :  { %1021 = vmatprep.mubr.msk.bf16.mxu1 %vm1118_vm0, %v1117_v0  ;;  %1006 = vmatpush3.bf16.msra.mxu1 %v1045_v9 }
 0x530   :  { %1007 = vmatprep.subr.bf16.mxu1 %v1117_v0 }
 0x533   :  { %1008 = vmatpush3.bf16.msra.mxu1 %v1046_v10 }
 0x534   :  { %1009 = vmatprep.subr.bf16.mxu1 %v1117_v0 }
 0x537   :  { %1010 = vmatpush3.bf16.msra.mxu1 %v1047_v11 }
 0x538   :  { %1011 = vmatprep.subr.bf16.mxu1 %v1117_v0 }
 0x53b   :  { %1012 = vmatpush3.bf16.msra.mxu1 %v1048_v21 }
 0x53c   :  { %1013 = vmatprep.subr.bf16.mxu1 %v1117_v0 }
 0x53f   :  { %1014 = vmatpush3.bf16.msra.mxu1 %v1049_v22 }
 0x540   :  { %1015 = vmatprep.subr.bf16.mxu1 %v1117_v0 }
 0x543   :  { %1016 = vmatpush3.bf16.msra.mxu1 %v1050_v23 }
 0x544   :  { %1017 = vmatprep.subr.bf16.mxu1 %v1117_v0 }
 0x547   :  { %1018 = vmatpush3.bf16.msra.mxu1 %v1051_v24 }
 0x548   :  { %1019 = vmatprep.subr.bf16.mxu1 %v1117_v0  ;;  %v740_v0 = vld [vmem:[%s1410_s5] ss:$0 sm:$0xff] }
 0x54b   :  { %1020 = vmatpush3.bf16.msra.mxu1 %v1052_v25 }
 0x5ee   :  { %v550_v13 = vpop.f32.mrf.mxu1 }
 0x5ef   :  { %v556_v14 = vadd.f32 %v550_v13, %v167_v12 }
 0x5f0   :  { %v983_v15 = vpop.f32.mrf.mxu1 }
 0x5f1   :  { %1065 = vtanh.f32 %v556_v14 }
 0x5f2   :  { %v553_v17 = vpop.f32.mrf.mxu1 }
 0x5f4   :  { %v984_v18 = vpop.f32.mrf.mxu1 }
 0x5fe   :  { %v1066_v19 = vpop.eup %1065 }
 0x5ff   :  { %v560_v20 = vpack.c.bf16 %v1066_v19, %v1066_v19 }
 0x601   :  { %1002 = vmatmul.mubr.bf16.vlgmr.msra.gmra.mxu0 %v560_v20 }
 0x6c1   :  { %v595_v27 = vpop.f32.mrf.mxu0 }
 0x6c2   :  { %v601_v28 = vadd.f32 %v595_v27, %v170_v26 }
 0x6c3   :  { %v1003_v29 = vpop.f32.mrf.mxu0 }
 0x6c4   :  { %1067 = vtanh.f32 %v601_v28 }
 0x6c5   :  { %v598_v31 = vpop.f32.mrf.mxu0 }
 0x6c7   :  { %v1004_v32 = vpop.f32.mrf.mxu0 }
 0x6d1   :  { %v1068_v33 = vpop.eup %1067 }
 0x6d2   :  { %v603_v34 = vpack.c.bf16 %v1068_v33, %v1068_v33 }
 0x6d4   :  { %1022 = vmatmul.mubr.bf16.vlgmr.msra.gmra.mxu1 %v603_v34 }
 0x794   :  { %v709_v35 = vpop.f32.mrf.mxu1 }
 0x795   :  { %v710_v36 = vadd.f32 %v740_v0, %v709_v35 }
 0x796   :  { %v1023_v37 = vpop.f32.mrf.mxu1 }
 0x797   :  { %715 = vst [vmem:[%s1411_s6] sm:$0xff] %v710_v36 }
 0x798   :  { %v712_v16 = vpop.f32.mrf.mxu1 }
 0x79a   :  { %v1024_v30 = vpop.f32.mrf.mxu1 }
 0x79b   :  { %720 = vsyncpa [#allocation4], 1 }
 0x79c   :  { %721 = vsyncpa [#allocation6], 1 }

</bundles_post_ra>
